<compile_context>
chip_gen: v6e
topology: v6e:2x2x1
jax: 0.10.0
libtpu: 0.0.40
codegen_flags: <defaults>
</compile_context>

<pallas_src>
import math
import functools

import numpy as np
import jax
import jax.numpy as jnp
from jax.experimental import pallas as pl
from jax.experimental.pallas import tpu as pltpu


def _round_up(v, m):
    return (v + m - 1) // m * m


def _vmem_limit_bytes():
    """~75% of physical VMEM: 96 MiB on the 128 MiB v5e/v6e parts, 48 MiB on
    v7x's 64 MiB (leaves headroom for compiler-internal scratch)."""
    try:
        cap = int(pltpu.get_tpu_info().vmem_capacity_bytes)
    except Exception:
        cap = 64 * 1024 * 1024      # v7x-safe fallback
    return (cap * 3) // 4


def _choose_row_tile(n_pad, c_pad, vmem_limit):
    """Largest dst-row tile TM (multiple of 32, divides n_pad, <= 512) whose
    per-step footprint fits the VMEM limit.  Per (TM x n_pad) element we budget
    2 B (double-buffered int8 mask tile) + 8 B (f32 softmax temporaries e, p)
    + 2 B (bf16 probability tile fed to the MXU); per TM row ~8*c_pad B of
    x/out tiles.  The resident (double-buffered) bf16 feat block and ~4 MiB of
    slack come off the top."""
    resident = 4 * n_pad * c_pad + 16 * n_pad + (4 << 20)
    per_row = 12 * n_pad + 8 * c_pad
    tm = (vmem_limit - resident) // max(per_row, 1)
    tm = max(32, min(512, min(tm, n_pad)))
    tm -= tm % 32
    while tm > 32 and n_pad % tm:
        tm -= 32
    if n_pad // tm < 2:                      # keep both v7x TensorCores busy
        tm = max(n_pad // 2, 32)             # n_pad is a multiple of 128
    return tm


# ---------------------------------------------------------------------------
# In-kernel attention rebuild (shared by every hop)
# ---------------------------------------------------------------------------
def _softmax_attention_tile(d_ref, s_ref, mask_ref):
    # d_ref   : (TM, 1)  f32   a_dst * (x @ w_att) for this dst-row tile
    # s_ref   : (1, N)   f32   a_src * (x @ w_att) for all source nodes (resident)
    # mask_ref: (TM, N)  int8  1 iff edge src -> dst (self-loops included)
    e = d_ref[...] + s_ref[...]                        # (TM, N) logits
    e = jnp.maximum(e, 0.2 * e)                        # LeakyReLU(0.2)
    e = jnp.where(mask_ref[...] != 0, e, jnp.float32(-1e30))
    e_max = jnp.max(e, axis=-1, keepdims=True)
    p = jnp.exp(e - e_max)                             # masked entries -> exactly 0
    denom = jnp.sum(p, axis=-1, keepdims=True)
    return (p / denom).astype(jnp.bfloat16)            # exact row-normalization


# ---------------------------------------------------------------------------
# Kernel 1: one PPR hop   feat_new = (1 - a) * A @ feat + a * x   (A rebuilt)
# Kernel 2: last hop fused with score Linear + tanh gating
# ---------------------------------------------------------------------------
def _hop_kernel(alpha, d_ref, s_ref, mask_ref, feat_ref, x_ref, out_ref):
    a = _softmax_attention_tile(d_ref, s_ref, mask_ref)
    acc = jnp.dot(a, feat_ref[...], preferred_element_type=jnp.float32)
    out_ref[...] = ((1.0 - alpha) * acc
                    + alpha * x_ref[...].astype(jnp.float32)).astype(out_ref.dtype)
    # TODO(synk): self.feat_drop (Dropout) is identity in eval mode; training-time
    # dropout masks are not applied here.


def _last_hop_kernel(alpha, d_ref, s_ref, mask_ref, feat_ref, x_ref, ws_ref,
                     b_ref, gated_ref, scores_ref):
    a = _softmax_attention_tile(d_ref, s_ref, mask_ref)
    acc = jnp.dot(a, feat_ref[...], preferred_element_type=jnp.float32)
    feat = (1.0 - alpha) * acc + alpha * x_ref[...]             # (TM, Cp) f32
    # score Linear(in_channels, 1) as a VPU broadcast-mul + lane reduce (keeps
    # the 1-output-column matvec off the MXU); bias comes from SMEM.
    scores = jnp.sum(feat * ws_ref[...], axis=-1, keepdims=True) + b_ref[0]
    scores_ref[...] = scores                                    # (TM, 1)
    gated_ref[...] = x_ref[...] * jnp.tanh(scores)              # (TM, Cp) f32


# ---------------------------------------------------------------------------
# Device-side driver: fused attention+hop kernels on padded arrays
# ---------------------------------------------------------------------------
def _magpool_device(x_f32, x_bf16, mask_i8, d_col, s_row, ws_p, b_vec, *,
                    hop_num, alpha, tm, vmem_limit):
    n_pad, c_pad = x_f32.shape
    g = n_pad // tm
    cparams = pltpu.CompilerParams(dimension_semantics=("parallel",),
                                   vmem_limit_bytes=vmem_limit)

    # Dominant traffic per hop: one int8 mask read (n_pad^2 B) + bf16 feat/x/out
    # streams; one exp per attention entry.
    hop_bytes = (n_pad * n_pad                 # int8 mask
                 + 3 * 2 * n_pad * c_pad       # feat read + x read + out write (bf16)
                 + 12 * n_pad)                 # d / s terms
    hop_cost = pl.CostEstimate(
        flops=2 * n_pad * n_pad * c_pad + 10 * n_pad * n_pad,
        transcendentals=n_pad * n_pad,
        bytes_accessed=hop_bytes)
    last_cost = pl.CostEstimate(
        flops=2 * n_pad * n_pad * c_pad + 10 * n_pad * n_pad + 6 * n_pad * c_pad,
        transcendentals=n_pad * n_pad + n_pad,
        bytes_accessed=hop_bytes + 6 * n_pad * c_pad + 8 * n_pad)

    row = lambda i: (i, 0)
    rep = lambda i: (0, 0)

    # ---- intermediate PPR hops (attention rebuilt in-kernel; feat resident) ----
    hop_call = pl.pallas_call(
        functools.partial(_hop_kernel, alpha),
        out_shape=jax.ShapeDtypeStruct((n_pad, c_pad), jnp.bfloat16),
        grid=(g,),
        in_specs=[pl.BlockSpec((tm, 1), row),           # d (dst term), row-tiled
                  pl.BlockSpec((1, n_pad), rep),        # s (src term), resident
                  pl.BlockSpec((tm, n_pad), row),       # int8 adjacency tile
                  pl.BlockSpec((n_pad, c_pad), rep),    # feat (bf16, resident)
                  pl.BlockSpec((tm, c_pad), row)],      # x tile (bf16)
        out_specs=pl.BlockSpec((tm, c_pad), row),
        compiler_params=cparams,
        cost_estimate=hop_cost,
    )

    # ---- last hop fused with score layer + tanh gating ----
    last_call = pl.pallas_call(
        functools.partial(_last_hop_kernel, alpha),
        out_shape=(jax.ShapeDtypeStruct((n_pad, c_pad), jnp.float32),   # gated
                   jax.ShapeDtypeStruct((n_pad, 1), jnp.float32)),      # scores
        grid=(g,),
        in_specs=[pl.BlockSpec((tm, 1), row),
                  pl.BlockSpec((1, n_pad), rep),
                  pl.BlockSpec((tm, n_pad), row),
                  pl.BlockSpec((n_pad, c_pad), rep),
                  pl.BlockSpec((tm, c_pad), row),       # x tile (f32: gating precision)
                  pl.BlockSpec((1, c_pad), rep),        # w_score (lane-padded)
                  pl.BlockSpec(memory_space=pltpu.MemorySpace.SMEM)],   # b_score
        out_specs=(pl.BlockSpec((tm, c_pad), row),
                   pl.BlockSpec((tm, 1), row)),
        compiler_params=cparams,
        cost_estimate=last_cost,
    )

    feat = x_bf16
    for _ in range(hop_num - 1):
        feat = hop_call(d_col, s_row, mask_i8, feat, x_bf16)
    gated, scores = last_call(d_col, s_row, mask_i8, feat, x_f32, ws_p, b_vec)
    return scores, gated


@functools.partial(jax.jit,
                   static_argnames=("k", "hop_num", "alpha", "tm", "n_pad",
                                    "c_pad", "vmem_limit"))
def _magpool_jit(x, src, dst, w_att, a_src, a_dst, w_score, b_score, *,
                 k, hop_num, alpha, tm, n_pad, c_pad, vmem_limit):
    n, c = x.shape

    # Dense adjacency mask A[dst, src] as int8; GATConv adds self-loops (also on
    # padded rows so their softmax stays well-defined).  Duplicate edges collapse
    # to a single entry (differs from PyG sparse 'sum' only if multi-edges exist).
    mask = jnp.zeros((n_pad, n_pad), jnp.int8).at[dst, src].set(1)
    diag = jnp.arange(n_pad)
    mask = mask.at[diag, diag].set(1)

    # Zero-pad node features (f32 for the gating/last hop, bf16 for the hops).
    x_p = jnp.zeros((n_pad, c_pad), jnp.float32).at[:n, :c].set(x)
    x_bf = x_p.astype(jnp.bfloat16)

    # Tiny GAT projection (N,C)@(C,1) hoisted to XLA: keeps the 1-column matvec
    # off the MXU and hands the kernels s already in lane (1, N) orientation.
    wx = x @ w_att                                                    # (n, 1)
    d_col = jnp.zeros((n_pad, 1), jnp.float32).at[:n].set(a_dst[0] * wx)
    s_row = jnp.zeros((1, n_pad), jnp.float32).at[0, :n].set((a_src[0] * wx)[:, 0])

    ws_p = jnp.zeros((1, c_pad), jnp.float32).at[0, :c].set(w_score[:, 0])
    b_vec = b_score.reshape(1).astype(jnp.float32)

    scores2d, gated = _magpool_device(x_p, x_bf, mask, d_col, s_row, ws_p, b_vec,
                                      hop_num=hop_num, alpha=alpha, tm=tm,
                                      vmem_limit=vmem_limit)
    scores = scores2d[:n, 0]
    gated = gated[:n, :c]

    # topk(scores, ratio, batch) with batch == zeros -> top ceil(ratio*N) nodes.
    perm = jnp.argsort(-scores)[:k]
    x_out = gated[perm]                        # = x[perm] * tanh(scores[perm])

    # filter_adj: remap endpoints on device; only the final variable-length
    # compaction (data-dependent output shape) is done on the host.
    node_map = jnp.full((n,), -1, jnp.int32).at[perm].set(
        jnp.arange(k, dtype=jnp.int32))
    new_src = node_map[src]
    new_dst = node_map[dst]
    keep = (new_src >= 0) & (new_dst >= 0)
    return x_out, perm, new_src, new_dst, keep


# ---------------------------------------------------------------------------
# Full MAGPool.forward (single graph; `batch` assumed all-zeros)
# ---------------------------------------------------------------------------
def magpool_forward(x, edge_index, params, *, ratio=0.5, hop_num=3, alpha=0.4):
    assert hop_num >= 1
    n, c = x.shape
    src = edge_index[0].astype(jnp.int32)
    dst = edge_index[1].astype(jnp.int32)

    c_pad = _round_up(c, 128)       # lane-dense feature / gated slabs
    n_pad = _round_up(n, 128)       # lane-dense mask tiles, clean MXU K dim
    vmem_limit = _vmem_limit_bytes()
    tm = _choose_row_tile(n_pad, c_pad, vmem_limit)

    k = int(math.ceil(ratio * n))
    x_out, perm, new_src, new_dst, keep = _magpool_jit(
        x, src, dst, params["w_att"], params["a_src"], params["a_dst"],
        params["w_score"], params["b_score"],
        k=k, hop_num=hop_num, alpha=float(alpha), tm=tm,
        n_pad=n_pad, c_pad=c_pad, vmem_limit=vmem_limit)

    batch_out = jnp.zeros((k,), jnp.int32)

    keep_np = np.asarray(keep)
    new_edge_index = jnp.asarray(
        np.stack([np.asarray(new_src)[keep_np],
                  np.asarray(new_dst)[keep_np]]).astype(np.int32))

    return x_out, new_edge_index, None, batch_out, perm


if __name__ == "__main__":
    key = jax.random.PRNGKey(0)
    N, C = 16, 32                       # num_nodes, in_channels
    ks = jax.random.split(key, 8)

    x = jax.random.normal(ks[0], (N, C), jnp.float32)

    # Small graph: ring + 8 random extra edges.
    ring_src = jnp.arange(N)
    ring_dst = (jnp.arange(N) + 1) % N
    rnd_src = jax.random.randint(ks[1], (8,), 0, N)
    rnd_dst = jax.random.randint(ks[2], (8,), 0, N)
    edge_index = jnp.stack([jnp.concatenate([ring_src, rnd_src]),
                            jnp.concatenate([ring_dst, rnd_dst])]).astype(jnp.int32)

    # Deterministic synthetic parameters (shapes from MAGPool.__init__):
    #   GATConv(in_channels, 1): lin weight (C, 1), att_src (1,), att_dst (1,)
    #   scorelayer = Linear(in_channels, 1): weight (C, 1), bias (1,)
    params = {
        "w_att":   0.1 * jax.random.normal(ks[3], (C, 1), jnp.float32),
        "a_src":   0.1 * jax.random.normal(ks[4], (1,), jnp.float32),
        "a_dst":   0.1 * jax.random.normal(ks[5], (1,), jnp.float32),
        "w_score": 0.1 * jax.random.normal(ks[6], (C, 1), jnp.float32),
        "b_score": 0.1 * jax.random.normal(ks[7], (1,), jnp.float32),
    }

    x_out, new_edge_index, edge_attr, batch_out, perm = magpool_forward(
        x, edge_index, params, ratio=0.5, hop_num=3, alpha=0.4)

    jax.block_until_ready(x_out)
    jax.block_until_ready(perm)
    assert x_out.shape == (8, C)
    assert perm.shape == (8,)
    print("KERNEL_OK")
</pallas_src>

<mosaic_0001>
module attributes {stable_mosaic.version = 11 : i64} {
  func.func @_hop_kernel(%arg0: i32, %arg1: memref<64x1xf32, #tpu.memory_space<vmem>>, %arg2: memref<1x128xf32, #tpu.memory_space<vmem>>, %arg3: memref<64x128xi8, #tpu.memory_space<vmem>>, %arg4: memref<128x128xbf16, #tpu.memory_space<vmem>>, %arg5: memref<64x128xbf16, #tpu.memory_space<vmem>>, %arg6: memref<64x128xbf16, #tpu.memory_space<vmem>>) attributes {dimension_semantics = [#tpu.dimension_semantics<parallel>], iteration_bounds = array<i64: 2>, scalar_prefetch = 0 : i64, scratch_operands = 0 : i64, tpu.core_type = #tpu.core_type<tc>, window_params = [{transform_indices = @transform_0, window_bounds = array<i64: 64, 1>}, {pipeline_mode = #tpu.pipeline_mode<synchronous>, transform_indices = @transform_1, window_bounds = array<i64: 1, 128>}, {transform_indices = @transform_2, window_bounds = array<i64: 64, 128>}, {pipeline_mode = #tpu.pipeline_mode<synchronous>, transform_indices = @transform_3, window_bounds = array<i64: 128, 128>}, {transform_indices = @transform_4, window_bounds = array<i64: 64, 128>}, {transform_indices = @transform_5, window_bounds = array<i64: 64, 128>}]} {
    %c0 = arith.constant 0 : index
    %c0_0 = arith.constant 0 : index
    %0 = vector.load %arg1[%c0, %c0_0] : memref<64x1xf32, #tpu.memory_space<vmem>>, vector<64x1xf32>
    %c0_1 = arith.constant 0 : index
    %c0_2 = arith.constant 0 : index
    %1 = vector.load %arg2[%c0_1, %c0_2] : memref<1x128xf32, #tpu.memory_space<vmem>>, vector<1x128xf32>
    %2 = vector.broadcast %0 : vector<64x1xf32> to vector<64x128xf32>
    %3 = vector.broadcast %1 : vector<1x128xf32> to vector<64x128xf32>
    %4 = arith.addf %2, %3 : vector<64x128xf32>
    %cst = arith.constant 2.000000e-01 : f32
    %5 = vector.broadcast %cst : f32 to vector<64x128xf32>
    %6 = arith.mulf %5, %4 : vector<64x128xf32>
    %7 = arith.maximumf %4, %6 : vector<64x128xf32>
    %c0_3 = arith.constant 0 : index
    %c0_4 = arith.constant 0 : index
    %8 = vector.load %arg3[%c0_3, %c0_4] : memref<64x128xi8, #tpu.memory_space<vmem>>, vector<64x128xi8>
    %c0_i8 = arith.constant 0 : i8
    %9 = vector.broadcast %c0_i8 : i8 to vector<64x128xi8>
    %10 = arith.cmpi ne, %8, %9 : vector<64x128xi8>
    %cst_5 = arith.constant -1.000000e+30 : f32
    %11 = vector.broadcast %cst_5 : f32 to vector<64x128xf32>
    %12 = arith.select %10, %7, %11 : vector<64x128xi1>, vector<64x128xf32>
    %cst_6 = arith.constant dense<0xFF800000> : vector<64xf32>
    %13 = vector.multi_reduction <maximumf>, %12, %cst_6 [1] : vector<64x128xf32> to vector<64xf32>
    %14 = vector.shape_cast %13 : vector<64xf32> to vector<64x1xf32>
    %15 = vector.broadcast %14 : vector<64x1xf32> to vector<64x128xf32>
    %16 = arith.subf %12, %15 : vector<64x128xf32>
    %17 = math.exp %16 : vector<64x128xf32>
    %cst_7 = arith.constant dense<0.000000e+00> : vector<64xf32>
    %18 = vector.multi_reduction <add>, %17, %cst_7 [1] : vector<64x128xf32> to vector<64xf32>
    %19 = vector.shape_cast %18 : vector<64xf32> to vector<64x1xf32>
    %20 = vector.broadcast %19 : vector<64x1xf32> to vector<64x128xf32>
    %21 = arith.divf %17, %20 : vector<64x128xf32>
    %22 = arith.truncf %21 : vector<64x128xf32> to vector<64x128xbf16>
    %c0_8 = arith.constant 0 : index
    %c0_9 = arith.constant 0 : index
    %23 = vector.load %arg4[%c0_8, %c0_9] : memref<128x128xbf16, #tpu.memory_space<vmem>>, vector<128x128xbf16>
    %cst_10 = arith.constant dense<0.000000e+00> : vector<64x128xf32>
    %24 = tpu.matmul %22, %23, %cst_10 {dimension_numbers = #tpu.dot_dimension_numbers<[1], [0], [0], [1], [0, 0, 1, 1], [], []>} : vector<64x128xbf16>, vector<128x128xbf16>, vector<64x128xf32> -> vector<64x128xf32>
    %cst_11 = arith.constant 6.000000e-01 : f32
    %25 = vector.broadcast %cst_11 : f32 to vector<64x128xf32>
    %26 = arith.mulf %25, %24 : vector<64x128xf32>
    %c0_12 = arith.constant 0 : index
    %c0_13 = arith.constant 0 : index
    %27 = vector.load %arg5[%c0_12, %c0_13] : memref<64x128xbf16, #tpu.memory_space<vmem>>, vector<64x128xbf16>
    %28 = arith.extf %27 : vector<64x128xbf16> to vector<64x128xf32>
    %cst_14 = arith.constant 4.000000e-01 : f32
    %29 = vector.broadcast %cst_14 : f32 to vector<64x128xf32>
    %30 = arith.mulf %29, %28 : vector<64x128xf32>
    %31 = arith.addf %26, %30 : vector<64x128xf32>
    %32 = arith.truncf %31 : vector<64x128xf32> to vector<64x128xbf16>
    %c0_15 = arith.constant 0 : index
    %c0_16 = arith.constant 0 : index
    %33 = vector.load %arg6[%c0_15, %c0_16] : memref<64x128xbf16, #tpu.memory_space<vmem>>, vector<64x128xbf16>
    tpu.vector_store %arg6[%c0_15, %c0_16], %32 {strides = array<i32>} : memref<64x128xbf16, #tpu.memory_space<vmem>>, vector<64x128xbf16>,
    return
  }
  func.func @transform_0(%arg0: i32) -> (i32, i32) {
    %c0_i32 = arith.constant 0 : i32
    %c0_i32_0 = arith.constant 0 : i32
    return %arg0, %c0_i32 : i32, i32
  }
  func.func @transform_1(%arg0: i32) -> (i32, i32) {
    %c0_i32 = arith.constant 0 : i32
    %c0_i32_0 = arith.constant 0 : i32
    %c0_i32_1 = arith.constant 0 : i32
    return %c0_i32, %c0_i32_0 : i32, i32
  }
  func.func @transform_2(%arg0: i32) -> (i32, i32) {
    %c0_i32 = arith.constant 0 : i32
    %c0_i32_0 = arith.constant 0 : i32
    return %arg0, %c0_i32 : i32, i32
  }
  func.func @transform_3(%arg0: i32) -> (i32, i32) {
    %c0_i32 = arith.constant 0 : i32
    %c0_i32_0 = arith.constant 0 : i32
    %c0_i32_1 = arith.constant 0 : i32
    return %c0_i32, %c0_i32_0 : i32, i32
  }
  func.func @transform_4(%arg0: i32) -> (i32, i32) {
    %c0_i32 = arith.constant 0 : i32
    %c0_i32_0 = arith.constant 0 : i32
    return %arg0, %c0_i32 : i32, i32
  }
  func.func @transform_5(%arg0: i32) -> (i32, i32) {
    %c0_i32 = arith.constant 0 : i32
    %c0_i32_0 = arith.constant 0 : i32
    return %arg0, %c0_i32 : i32, i32
  }
}

module attributes {stable_mosaic.version = 11 : i64} {
  func.func @_last_hop_kernel(%arg0: i32, %arg1: memref<64x1xf32, #tpu.memory_space<vmem>>, %arg2: memref<1x128xf32, #tpu.memory_space<vmem>>, %arg3: memref<64x128xi8, #tpu.memory_space<vmem>>, %arg4: memref<128x128xbf16, #tpu.memory_space<vmem>>, %arg5: memref<64x128xf32, #tpu.memory_space<vmem>>, %arg6: memref<1x128xf32, #tpu.memory_space<vmem>>, %arg7: memref<1xf32, #tpu.memory_space<smem>>, %arg8: memref<64x128xf32, #tpu.memory_space<vmem>>, %arg9: memref<64x1xf32, #tpu.memory_space<vmem>>) attributes {dimension_semantics = [#tpu.dimension_semantics<parallel>], iteration_bounds = array<i64: 2>, scalar_prefetch = 0 : i64, scratch_operands = 0 : i64, tpu.core_type = #tpu.core_type<tc>, window_params = [{transform_indices = @transform_0, window_bounds = array<i64: 64, 1>}, {pipeline_mode = #tpu.pipeline_mode<synchronous>, transform_indices = @transform_1, window_bounds = array<i64: 1, 128>}, {transform_indices = @transform_2, window_bounds = array<i64: 64, 128>}, {pipeline_mode = #tpu.pipeline_mode<synchronous>, transform_indices = @transform_3, window_bounds = array<i64: 128, 128>}, {transform_indices = @transform_4, window_bounds = array<i64: 64, 128>}, {pipeline_mode = #tpu.pipeline_mode<synchronous>, transform_indices = @transform_5, window_bounds = array<i64: 1, 128>}, {transform_indices = @transform_6, window_bounds = array<i64: 1>}, {transform_indices = @transform_7, window_bounds = array<i64: 64, 128>}, {transform_indices = @transform_8, window_bounds = array<i64: 64, 1>}]} {
    %c0 = arith.constant 0 : index
    %c0_0 = arith.constant 0 : index
    %0 = vector.load %arg1[%c0, %c0_0] : memref<64x1xf32, #tpu.memory_space<vmem>>, vector<64x1xf32>
    %c0_1 = arith.constant 0 : index
    %c0_2 = arith.constant 0 : index
    %1 = vector.load %arg2[%c0_1, %c0_2] : memref<1x128xf32, #tpu.memory_space<vmem>>, vector<1x128xf32>
    %2 = vector.broadcast %0 : vector<64x1xf32> to vector<64x128xf32>
    %3 = vector.broadcast %1 : vector<1x128xf32> to vector<64x128xf32>
    %4 = arith.addf %2, %3 : vector<64x128xf32>
    %cst = arith.constant 2.000000e-01 : f32
    %5 = vector.broadcast %cst : f32 to vector<64x128xf32>
    %6 = arith.mulf %5, %4 : vector<64x128xf32>
    %7 = arith.maximumf %4, %6 : vector<64x128xf32>
    %c0_3 = arith.constant 0 : index
    %c0_4 = arith.constant 0 : index
    %8 = vector.load %arg3[%c0_3, %c0_4] : memref<64x128xi8, #tpu.memory_space<vmem>>, vector<64x128xi8>
    %c0_i8 = arith.constant 0 : i8
    %9 = vector.broadcast %c0_i8 : i8 to vector<64x128xi8>
    %10 = arith.cmpi ne, %8, %9 : vector<64x128xi8>
    %cst_5 = arith.constant -1.000000e+30 : f32
    %11 = vector.broadcast %cst_5 : f32 to vector<64x128xf32>
    %12 = arith.select %10, %7, %11 : vector<64x128xi1>, vector<64x128xf32>
    %cst_6 = arith.constant dense<0xFF800000> : vector<64xf32>
    %13 = vector.multi_reduction <maximumf>, %12, %cst_6 [1] : vector<64x128xf32> to vector<64xf32>
    %14 = vector.shape_cast %13 : vector<64xf32> to vector<64x1xf32>
    %15 = vector.broadcast %14 : vector<64x1xf32> to vector<64x128xf32>
    %16 = arith.subf %12, %15 : vector<64x128xf32>
    %17 = math.exp %16 : vector<64x128xf32>
    %cst_7 = arith.constant dense<0.000000e+00> : vector<64xf32>
    %18 = vector.multi_reduction <add>, %17, %cst_7 [1] : vector<64x128xf32> to vector<64xf32>
    %19 = vector.shape_cast %18 : vector<64xf32> to vector<64x1xf32>
    %20 = vector.broadcast %19 : vector<64x1xf32> to vector<64x128xf32>
    %21 = arith.divf %17, %20 : vector<64x128xf32>
    %22 = arith.truncf %21 : vector<64x128xf32> to vector<64x128xbf16>
    %c0_8 = arith.constant 0 : index
    %c0_9 = arith.constant 0 : index
    %23 = vector.load %arg4[%c0_8, %c0_9] : memref<128x128xbf16, #tpu.memory_space<vmem>>, vector<128x128xbf16>
    %cst_10 = arith.constant dense<0.000000e+00> : vector<64x128xf32>
    %24 = tpu.matmul %22, %23, %cst_10 {dimension_numbers = #tpu.dot_dimension_numbers<[1], [0], [0], [1], [0, 0, 1, 1], [], []>} : vector<64x128xbf16>, vector<128x128xbf16>, vector<64x128xf32> -> vector<64x128xf32>
    %cst_11 = arith.constant 6.000000e-01 : f32
    %25 = vector.broadcast %cst_11 : f32 to vector<64x128xf32>
    %26 = arith.mulf %25, %24 : vector<64x128xf32>
    %c0_12 = arith.constant 0 : index
    %c0_13 = arith.constant 0 : index
    %27 = vector.load %arg5[%c0_12, %c0_13] : memref<64x128xf32, #tpu.memory_space<vmem>>, vector<64x128xf32>
    %cst_14 = arith.constant 4.000000e-01 : f32
    %28 = vector.broadcast %cst_14 : f32 to vector<64x128xf32>
    %29 = arith.mulf %28, %27 : vector<64x128xf32>
    %30 = arith.addf %26, %29 : vector<64x128xf32>
    %c0_15 = arith.constant 0 : index
    %c0_16 = arith.constant 0 : index
    %31 = vector.load %arg6[%c0_15, %c0_16] : memref<1x128xf32, #tpu.memory_space<vmem>>, vector<1x128xf32>
    %32 = vector.broadcast %31 : vector<1x128xf32> to vector<64x128xf32>
    %33 = arith.mulf %30, %32 : vector<64x128xf32>
    %cst_17 = arith.constant dense<0.000000e+00> : vector<64xf32>
    %34 = vector.multi_reduction <add>, %33, %cst_17 [1] : vector<64x128xf32> to vector<64xf32>
    %35 = vector.shape_cast %34 : vector<64xf32> to vector<64x1xf32>
    %c0_18 = arith.constant 0 : index
    %36 = memref.load %arg7[%c0_18] : memref<1xf32, #tpu.memory_space<smem>>
    %37 = vector.broadcast %36 : f32 to vector<64x1xf32>
    %38 = arith.addf %35, %37 : vector<64x1xf32>
    %c0_19 = arith.constant 0 : index
    %c0_20 = arith.constant 0 : index
    %39 = vector.load %arg9[%c0_19, %c0_20] : memref<64x1xf32, #tpu.memory_space<vmem>>, vector<64x1xf32>
    tpu.vector_store %arg9[%c0_19, %c0_20], %38 {strides = array<i32>} : memref<64x1xf32, #tpu.memory_space<vmem>>, vector<64x1xf32>,
    %c0_21 = arith.constant 0 : index
    %c0_22 = arith.constant 0 : index
    %40 = vector.load %arg5[%c0_21, %c0_22] : memref<64x128xf32, #tpu.memory_space<vmem>>, vector<64x128xf32>
    %41 = math.tanh %38 : vector<64x1xf32>
    %42 = vector.broadcast %41 : vector<64x1xf32> to vector<64x128xf32>
    %43 = arith.mulf %40, %42 : vector<64x128xf32>
    %c0_23 = arith.constant 0 : index
    %c0_24 = arith.constant 0 : index
    %44 = vector.load %arg8[%c0_23, %c0_24] : memref<64x128xf32, #tpu.memory_space<vmem>>, vector<64x128xf32>
    tpu.vector_store %arg8[%c0_23, %c0_24], %43 {strides = array<i32>} : memref<64x128xf32, #tpu.memory_space<vmem>>, vector<64x128xf32>,
    return
  }
  func.func @transform_0(%arg0: i32) -> (i32, i32) {
    %c0_i32 = arith.constant 0 : i32
    %c0_i32_0 = arith.constant 0 : i32
    return %arg0, %c0_i32 : i32, i32
  }
  func.func @transform_1(%arg0: i32) -> (i32, i32) {
    %c0_i32 = arith.constant 0 : i32
    %c0_i32_0 = arith.constant 0 : i32
    %c0_i32_1 = arith.constant 0 : i32
    return %c0_i32, %c0_i32_0 : i32, i32
  }
  func.func @transform_2(%arg0: i32) -> (i32, i32) {
    %c0_i32 = arith.constant 0 : i32
    %c0_i32_0 = arith.constant 0 : i32
    return %arg0, %c0_i32 : i32, i32
  }
  func.func @transform_3(%arg0: i32) -> (i32, i32) {
    %c0_i32 = arith.constant 0 : i32
    %c0_i32_0 = arith.constant 0 : i32
    %c0_i32_1 = arith.constant 0 : i32
    return %c0_i32, %c0_i32_0 : i32, i32
  }
  func.func @transform_4(%arg0: i32) -> (i32, i32) {
    %c0_i32 = arith.constant 0 : i32
    %c0_i32_0 = arith.constant 0 : i32
    return %arg0, %c0_i32 : i32, i32
  }
  func.func @transform_5(%arg0: i32) -> (i32, i32) {
    %c0_i32 = arith.constant 0 : i32
    %c0_i32_0 = arith.constant 0 : i32
    %c0_i32_1 = arith.constant 0 : i32
    return %c0_i32, %c0_i32_0 : i32, i32
  }
  func.func @transform_6(%arg0: i32) -> i32 {
    %c0_i32 = arith.constant 0 : i32
    %c0_i32_0 = arith.constant 0 : i32
    return %c0_i32 : i32
  }
  func.func @transform_7(%arg0: i32) -> (i32, i32) {
    %c0_i32 = arith.constant 0 : i32
    %c0_i32_0 = arith.constant 0 : i32
    return %arg0, %c0_i32 : i32, i32
  }
  func.func @transform_8(%arg0: i32) -> (i32, i32) {
    %c0_i32 = arith.constant 0 : i32
    %c0_i32_0 = arith.constant 0 : i32
    return %arg0, %c0_i32 : i32, i32
  }
}

</mosaic_0001>

<bundles_post_ra>
// kernel: _magpool_jit.3
= control target key start
LH: loop header
LB: loop body
LE: loop exit
PB: predicated region body
PF: predicated region fallthrough
CT: control target
= control target key end

     0   :  { %s991_s18 = smov 0   ;;  %s1115_s0 = inlined_call_operand.vmem [shape: f32[128,1], index: 0, kind: input, shape index: {}]   ;;  %s1116_s1 = inlined_call_operand.vmem [shape: f32[1,128], index: 1, kind: input, shape index: {}]   ;;  %s1117_s2 = inlined_call_operand.vmem [shape: s8[128,128], index: 2, kind: input, shape index: {}]   ;;  %s1118_s3 = inlined_call_operand.vmem [shape: bf16[128,128], index: 3, kind: input, shape index: {}, may-alias: {3,4}]   ;;  %s1119_s4 = inlined_call_operand.vmem [shape: bf16[128,128], index: 4, kind: input, shape index: {}, may-alias: {3,4}]   ;;  %s1120_s5 = inlined_call_operand.vmem [shape: bf16[128,128], index: 5, kind: output, shape index: {}]  }
   0x1 LB: > { %s767_s19 = sadd.s32 4294967295, %s958_s18   ;;  %p771_p0 = scmp.ge.s32.totalorder %s958_s18, 1  ;;  %s958_s18 = sphi %s991_s18, %s15_s18  }
   0x2   : > { %p210_p1 = scmp.lt.s32.totalorder %s958_s18, 3 }
   0x4   : > { %p211_p2 = pnand %p771_p0, %p210_p1 }
   0x5   : > { %s772_s20 = sshll.u32 (!%p211_p2), %s767_s19, 3 }
   0x6   : > { %214 = sbr.rel (%p211_p2) target bundleno = 682 (0x2aa), region = 40  ;;  %p249_p3 = scmp.lt.s32.totalorder (!%p211_p2), %s772_s20, 15 }
   0xb   : > { %v960_v0 = vmov 0   ;;  %s1126_s20 = smov (!%p249_p3, %s772_s20), 15  ;;  %v780_v14 = vld [vmem:[%s1116_s1] ss:$0 sm:$0xff] }
   0xc   : > { %911 = vset.pattern.permute.xlu1 %v960_v0  ;;  %910 = vset.pattern.permute.xlu0 %v960_v0  ;;  %s773_s21 = sshll.u32 %s1126_s20, 3  ;;  %s775_s25 = sshll.u32 %s1126_s20, 1 }
   0xd   : > { %s252_s24 = scalar_lea.vmem %s1115_s0, %s773_s21  ;;  %s1011_s28 = scalar_lea.vmem %s1117_s2, %s775_s25 }
   0xe   : > { %v279_v1 = vld [vmem:[%s252_s24 + $0x20] sm:$0xff]  ;;  %v280_v3 = vld [vmem:[%s252_s24 + $0x28] sm:$0xff]  ;;  %v278_v5 = vld [vmem:[%s252_s24 + $0x18] sm:$0xff] }
   0xf   : > { %v275_v2 = vld [vmem:[%s252_s24] sm:$0xff]  ;;  %306 = vperm.xlu1 %911, %v279_v1   ;;  %v276_v4 = vld [vmem:[%s252_s24 + $0x8] sm:$0xff]  ;;  %v277_v6 = vld [vmem:[%s252_s24 + $0x10] sm:$0xff] }
  0x10   : > { %286 = vperm.xlu0 %910, %v275_v2   ;;  %v282_v7 = vld [vmem:[%s252_s24 + $0x38] sm:$0xff]  ;;  %v281_v8 = vld [vmem:[%s252_s24 + $0x30] sm:$0xff]  ;;  %v354_v9 = vld [vmem:[%s1011_s28] sm:$0x3]  ;;  %s777_s24 = sshll.u32 %s1126_s20, 2 }
  0x11   : > { %v358_v10 = vld [vmem:[%s1011_s28 + $0x8] sm:$0x3]  ;;  %vm362_vm0 = vnez %v354_v9  ;;  %v355_v11 = vld [vmem:[%s1011_s28 + $0x2] sm:$0x3]  ;;  %v359_v12 = vld [vmem:[%s1011_s28 + $0xa] sm:$0x3]  ;;  %s264_s27 = scalar_lea.vmem %s1119_s4, %s777_s24  ;;  %s270_s30 = scalar_lea.vmem %s1120_s5, %s777_s24 }
  0x12   : > { %vm366_vm1 = vnez %v358_v10  ;;  %v370_v13 = vsel %vm362_vm0, 16843009, %v960_v0  ;;  %vm363_vm2 = vnez %v355_v11  ;;  %vm367_vm3 = vnez %v359_v12  ;;  %v356_v16 = vld [vmem:[%s1011_s28 + $0x4] sm:$0x3]  ;;  %v357_v23 = vld [vmem:[%s1011_s28 + $0x6] sm:$0x3] }
  0x13   : > { %311 = vperm.xlu1 %911, %v280_v3   ;;  %v374_v15 = vsel %vm366_vm1, 16843009, %v960_v0  ;;  %v378_v19 = vunpack.c.0.s8 %v370_v13  ;;  %v371_v22 = vsel %vm363_vm2, 16843009, %v960_v0  ;;  %v375_v25 = vsel %vm367_vm3, 16843009, %v960_v0 }
  0x14   : > { %291 = vperm.xlu0 %910, %v276_v4   ;;  %v382_v24 = vunpack.c.0.s8 %v374_v15  ;;  %vm364_vm4 = vnez %v356_v16  ;;  %v360_v28 = vld [vmem:[%s1011_s28 + $0xc] sm:$0x3]  ;;  %v379_v31 = vunpack.c.0.s8 %v371_v22  ;;  %vm365_vm6 = vnez %v357_v23  ;;  %v361_v39 = vld [vmem:[%s1011_s28 + $0xe] sm:$0x3]  ;;  %v912_v12 = vld [vmem:[%s1118_s3 + $0x38] sm:$0xff]  }
  0x15   : > { %vm386_vm5 = vcmp.ne.s32.totalorder %v378_v19, 0  ;;  %v372_v35 = vsel %vm364_vm4, 16843009, %v960_v0  ;;  %v383_v38 = vunpack.c.0.s8 %v375_v25  ;;  %vm368_vm8 = vnez %v360_v28  ;;  %861 = vmatprep.subr.bf16.mxu0 %v912_v12  ;;  %885 = vmatprep.subr.bf16.mxu1 %v912_v12 }
  0x16   : > { %vm1028_vm7 = vcmp.ne.s32.totalorder %v382_v24, 0  ;;  %vm387_vm9 = vcmp.ne.s32.totalorder %v379_v31, 0  ;;  %v380_v45 = vunpack.c.0.s8 %v372_v35  ;;  %v373_v46 = vsel %vm365_vm6, 16843009, %v960_v0  ;;  %862 = vmatpush3.bf16.msra.mxu0 %v912_v12  ;;  %893 = vmatpush3.bf16.msra.mxu1 %v912_v12 }
  0x17   : > { %301 = vperm.xlu1 %911, %v278_v5   ;;  %v376_v50 = vsel %vm368_vm8, 16843009, %v960_v0  ;;  %vm1038_vm10 = vcmp.ne.s32.totalorder %v383_v38, 0  ;;  %vm369_vm11 = vnez %v361_v39  ;;  %v381_v59 = vunpack.c.0.s8 %v373_v46  ;;  %v914_v46 = vld [vmem:[%s1118_s3 + $0x28] sm:$0xff]  }
  0x18   : > { %296 = vperm.xlu0 %910, %v277_v6   ;;  %vm388_vm12 = vcmp.ne.s32.totalorder %v380_v45, 0  ;;  %v384_v60 = vunpack.c.0.s8 %v376_v50  ;;  %v377_v1 = vsel %vm369_vm11, 16843009, %v960_v0  ;;  %v918_v50 = vld [vmem:[%s1118_s3 + $0x8] sm:$0xff]  }
  0x19   : > { %vm389_vm13 = vcmp.ne.s32.totalorder %v381_v59, 0 }
  0x1a   : > { %vm392_vm14 = vcmp.ne.s32.totalorder %v384_v60, 0 }
  0x1b   : > { %321 = vperm.xlu1 %911, %v282_v7   ;;  %v385_v7 = vunpack.c.0.s8 %v377_v1 }
  0x1c   : > { %316 = vperm.xlu0 %910, %v281_v8  }
  0x1d   : > { %vm393_vm15 = vcmp.ne.s32.totalorder %v385_v7, 0 }
  0x8a   : > { %v307_v17 = vpop.permute.xlu1 %306 }
  0x8b   : > { %v287_v18 = vpop.permute.xlu0 %286  ;;  %v334_v20 = vadd.f32 %v780_v14, %v307_v17 }
  0x8c   : > { %v330_v21 = vadd.f32 %v780_v14, %v287_v18 }
  0x8d   : > { %v342_v26 = vmul.f32 0.2, %v334_v20 }
  0x8e   : > { %v338_v27 = vmul.f32 0.2, %v330_v21  ;;  %v312_v29 = vpop.permute.xlu1 %311 }
  0x8f   : > { %v292_v30 = vpop.permute.xlu0 %291  ;;  %v335_v32 = vadd.f32 %v780_v14, %v312_v29  ;;  %v350_v36 = vmax.f32 %v334_v20, %v342_v26 }
  0x90   : > { %v331_v33 = vadd.f32 %v780_v14, %v292_v30  ;;  %v346_v34 = vmax.f32 %v330_v21, %v338_v27 }
  0x91   : > { %v343_v40 = vmul.f32 0.2, %v335_v32  ;;  %v398_v51 = vsel %vm1028_vm7, %v350_v36, -1e+30 }
  0x92   : > { %v339_v41 = vmul.f32 0.2, %v331_v33  ;;  %v394_v42 = vsel %vm386_vm5, %v346_v34, -1e+30  ;;  %v302_v43 = vpop.permute.xlu1 %301 }
  0x93   : > { %402 = vmax.xlane.f32.xlu0 %v394_v42  ;;  %v297_v44 = vpop.permute.xlu0 %296  ;;  %v333_v47 = vadd.f32 %v780_v14, %v302_v43  ;;  %v351_v52 = vmax.f32 %v335_v32, %v343_v40 }
  0x94   : > { %v332_v48 = vadd.f32 %v780_v14, %v297_v44  ;;  %v347_v49 = vmax.f32 %v331_v33, %v339_v41 }
  0x95   : > { %v341_v54 = vmul.f32 0.2, %v333_v47  ;;  %v399_v2 = vsel %vm1038_vm10, %v351_v52, -1e+30 }
  0x96   : > { %v340_v55 = vmul.f32 0.2, %v332_v48  ;;  %v395_v56 = vsel %vm387_vm9, %v347_v49, -1e+30  ;;  %v322_v57 = vpop.permute.xlu1 %321  ;;  %v917_v49 = vld [vmem:[%s1118_s3 + $0x10] sm:$0xff]  }
  0x97   : > { %410 = vmax.xlane.f32.xlu0 %v398_v51  ;;  %404 = vmax.xlane.f32.xlu1 %v395_v56  ;;  %v317_v58 = vpop.permute.xlu0 %316  ;;  %v337_v61 = vadd.f32 %v780_v14, %v322_v57  ;;  %v349_v6 = vmax.f32 %v333_v47, %v341_v54  ;;  %v915_v47 = vld [vmem:[%s1118_s3 + $0x20] sm:$0xff]  }
  0x98   : > { %v336_v62 = vadd.f32 %v780_v14, %v317_v58  ;;  %v348_v63 = vmax.f32 %v332_v48, %v340_v55  ;;  %v916_v48 = vld [vmem:[%s1118_s3 + $0x18] sm:$0xff]  }
  0x99   : > { %v345_v3 = vmul.f32 0.2, %v337_v61  ;;  %v397_v9 = vsel %vm389_vm13, %v349_v6, -1e+30 }
  0x9a   : > { %v344_v4 = vmul.f32 0.2, %v336_v62  ;;  %v396_v5 = vsel %vm388_vm12, %v348_v63, -1e+30 }
  0x9b   : > { %412 = vmax.xlane.f32.xlu0 %v399_v2  ;;  %406 = vmax.xlane.f32.xlu1 %v396_v5  ;;  %v353_v11 = vmax.f32 %v337_v61, %v345_v3 }
  0x9c   : > { %v352_v8 = vmax.f32 %v336_v62, %v344_v4 }
  0x9d   : > { %v401_v0 = vsel %vm393_vm15, %v353_v11, -1e+30 }
  0x9e   : > { %v400_v10 = vsel %vm392_vm14, %v352_v8, -1e+30 }
  0x9f   : > { %408 = vmax.xlane.f32.xlu0 %v397_v9  ;;  %414 = vmax.xlane.f32.xlu1 %v400_v10 }
  0xa3   : > { %416 = vmax.xlane.f32.xlu0 %v401_v0 }
 0x11c   : > { %v403_v13 = vpop.xlane.xlu0 %402 }
 0x11d   : > { %v418_v14 = vsub.f32 %v394_v42, %v403_v13  ;;  %v913_v42 = vld [vmem:[%s1118_s3 + $0x30] sm:$0xff]  }
 0x11e   : > { %863 = vmatprep.subr.bf16.mxu0 %v913_v42  ;;  %886 = vmatprep.subr.bf16.mxu1 %v913_v42 }
 0x11f   : > { %v426_v15 = vmul.f32 1.442695, %v418_v14  ;;  %864 = vmatpush3.bf16.msra.mxu0 %v913_v42  ;;  %894 = vmatpush3.bf16.msra.mxu1 %v913_v42 }
 0x120   : > { %v405_v16 = vpop.xlane.xlu1 %404  ;;  %v411_v17 = vpop.xlane.xlu0 %410  ;;  %865 = vmatprep.subr.bf16.mxu0 %v914_v46  ;;  %887 = vmatprep.subr.bf16.mxu1 %v914_v46 }
 0x121   : > { %920 = vpow2.f32 %v426_v15  ;;  %v419_v18 = vsub.f32 %v395_v56, %v405_v16  ;;  %v422_v19 = vsub.f32 %v398_v51, %v411_v17  ;;  %v919_v51 = vld [vmem:[%s1118_s3] sm:$0xff]   ;;  %v843_v16 = vld [vmem:[%s264_s27 + $0x8] sm:$0xff]  }
 0x122   : > { %v808_v17 = vld [vmem:[%s264_s27] sm:$0xff]  }
 0x123   : > { %v428_v20 = vmul.f32 1.442695, %v419_v18  ;;  %v434_v21 = vmul.f32 1.442695, %v422_v19  ;;  %866 = vmatpush3.bf16.msra.mxu0 %v914_v46  ;;  %895 = vmatpush3.bf16.msra.mxu1 %v914_v46  ;;  %v813_v18 = vunpack.c.l.bf16 %v843_v16  ;;  %v814_v19 = vunpack.c.h.bf16 %v843_v16 }
 0x124   : > { %v407_v22 = vpop.xlane.xlu1 %406  ;;  %v413_v23 = vpop.xlane.xlu0 %412  ;;  %867 = vmatprep.subr.bf16.mxu0 %v915_v47  ;;  %888 = vmatprep.subr.bf16.mxu1 %v915_v47 }
 0x125   : > { %922 = vpow2.f32 %v428_v20  ;;  %v420_v24 = vsub.f32 %v396_v5, %v407_v22  ;;  %v423_v25 = vsub.f32 %v399_v2, %v413_v23  ;;  %v845_v20 = vld [vmem:[%s264_s27 + $0x18] sm:$0xff]   ;;  %v809_v22 = vunpack.c.l.bf16 %v808_v17  ;;  %v844_v23 = vld [vmem:[%s264_s27 + $0x10] sm:$0xff]  }
 0x126   : > { %924 = vpow2.f32 %v434_v21 }
 0x127   : > { %v430_v26 = vmul.f32 1.442695, %v420_v24  ;;  %v436_v27 = vmul.f32 1.442695, %v423_v25  ;;  %868 = vmatpush3.bf16.msra.mxu0 %v915_v47  ;;  %896 = vmatpush3.bf16.msra.mxu1 %v915_v47  ;;  %v810_v24 = vunpack.c.h.bf16 %v808_v17 }
 0x128   : > { %v415_v28 = vpop.xlane.xlu1 %414  ;;  %v409_v29 = vpop.xlane.xlu0 %408  ;;  %869 = vmatprep.subr.bf16.mxu0 %v916_v48  ;;  %889 = vmatprep.subr.bf16.mxu1 %v916_v48 }
 0x129   : > { %926 = vpow2.f32 %v430_v26  ;;  %v424_v30 = vsub.f32 %v400_v10, %v415_v28  ;;  %v421_v31 = vsub.f32 %v397_v9, %v409_v29  ;;  %v821_v26 = vunpack.c.l.bf16 %v845_v20 }
 0x12a   : > { %928 = vpow2.f32 %v436_v27  ;;  %v822_v27 = vunpack.c.h.bf16 %v845_v20  ;;  %v633_v29 = vmul.f32 0.4, %v813_v18 }
 0x12b   : > { %v438_v32 = vmul.f32 1.442695, %v424_v30  ;;  %v432_v33 = vmul.f32 1.442695, %v421_v31  ;;  %870 = vmatpush3.bf16.msra.mxu0 %v916_v48  ;;  %897 = vmatpush3.bf16.msra.mxu1 %v916_v48  ;;  %v634_v30 = vmul.f32 0.4, %v814_v19 }
 0x12c   : > { %v417_v34 = vpop.xlane.xlu0 %416  ;;  %871 = vmatprep.subr.bf16.mxu0 %v917_v49  ;;  %890 = vmatprep.subr.bf16.mxu1 %v917_v49 }
 0x12d   : > { %930 = vpow2.f32 %v438_v32  ;;  %v425_v35 = vsub.f32 %v401_v0, %v417_v34  ;;  %v817_v32 = vunpack.c.l.bf16 %v844_v23 }
 0x12e   : > { %v1048_v36 = vpop.eup %920  ;;  %932 = vpow2.f32 %v432_v33  ;;  %v631_v33 = vmul.f32 0.4, %v809_v22 }
 0x12f   : > { %v440_v37 = vmul.f32 1.442695, %v425_v35  ;;  %442 = vadd.xlane.f32.xlu1 %v1048_v36  ;;  %872 = vmatpush3.bf16.msra.mxu0 %v917_v49  ;;  %v818_v35 = vunpack.c.h.bf16 %v844_v23  ;;  %v635_v47 = vmul.f32 0.4, %v817_v32 }
 0x130   : > { %898 = vmatpush3.bf16.msra.mxu1 %v917_v49  ;;  %873 = vmatprep.subr.bf16.mxu0 %v918_v50 }
 0x131   : > { %934 = vpow2.f32 %v440_v37  ;;  %891 = vmatprep.subr.bf16.mxu1 %v918_v50 }
 0x132   : > { %v1051_v38 = vpop.eup %922 }
 0x133   : > { %v1053_v39 = vpop.eup %924  ;;  %444 = vadd.xlane.f32.xlu0 %v1051_v38  ;;  %874 = vmatpush3.bf16.msra.mxu0 %v918_v50 }
 0x134   : > { %450 = vadd.xlane.f32.xlu1 %v1053_v39  ;;  %899 = vmatpush3.bf16.msra.mxu1 %v918_v50 }
 0x135   : > { %875 = vmatprep.subr.bf16.mxu0 %v919_v51  ;;  %892 = vmatprep.subr.bf16.mxu1 %v919_v51 }
 0x136   : > { %v1057_v40 = vpop.eup %926 }
 0x137   : > { %v1059_v41 = vpop.eup %928  ;;  %876 = vmatpush3.bf16.msra.mxu0 %v919_v51 }
 0x138   : > { %446 = vadd.xlane.f32.xlu1 %v1057_v40  ;;  %452 = vadd.xlane.f32.xlu0 %v1059_v41 }
 0x139   : > { %900 = vmatpush3.bf16.msra.mxu1 %v919_v51  ;;  %v636_v51 = vmul.f32 0.4, %v818_v35 }
 0x13a   : > { %v1066_v43 = vpop.eup %930 }
 0x13b   : > { %v1068_v44 = vpop.eup %932 }
 0x13c   : > { %454 = vadd.xlane.f32.xlu1 %v1066_v43  ;;  %448 = vadd.xlane.f32.xlu0 %v1068_v44 }
 0x13e   : > { %v1072_v45 = vpop.eup %934 }
 0x140   : > { %456 = vadd.xlane.f32.xlu0 %v1072_v45 }
 0x1b8   : > { %v443_v52 = vpop.xlane.xlu1 %442 }
 0x1b9   : > { %936 = vrcp.f32 %v443_v52 }
 0x1bc   : > { %v445_v53 = vpop.xlane.xlu0 %444 }
 0x1bd   : > { %v451_v54 = vpop.xlane.xlu1 %450  ;;  %938 = vrcp.f32 %v445_v53 }
 0x1be   : > { %940 = vrcp.f32 %v451_v54 }
 0x1c1   : > { %v447_v55 = vpop.xlane.xlu1 %446  ;;  %v453_v56 = vpop.xlane.xlu0 %452 }
 0x1c2   : > { %942 = vrcp.f32 %v453_v56 }
 0x1c3   : > { %944 = vrcp.f32 %v447_v55 }
 0x1c5   : > { %v455_v57 = vpop.xlane.xlu1 %454  ;;  %v449_v58 = vpop.xlane.xlu0 %448 }
 0x1c6   : > { %946 = vrcp.f32 %v449_v58  ;;  %v937_v59 = vpop.eup %936 }
 0x1c7   : > { %948 = vrcp.f32 %v455_v57  ;;  %v459_v62 = vmul.f32 %v937_v59, %v1048_v36 }
 0x1c9   : > { %v457_v60 = vpop.xlane.xlu0 %456 }
 0x1ca   : > { %v939_v61 = vpop.eup %938  ;;  %950 = vrcp.f32 %v457_v60 }
 0x1cb   : > { %v461_v63 = vmul.f32 %v939_v61, %v1051_v38  ;;  %v941_v2 = vpop.eup %940  ;;  %v632_v38 = vmul.f32 0.4, %v810_v24 }
 0x1cc   : > { %v467_v4 = vmul.f32 %v941_v2, %v1053_v39 }
 0x1cd   : > { %v474_v1 = vpack.c.bf16 %v461_v63, %v459_v62 }
 0x1cf   : > { %877 = vmatprep.mubr.bf16.mxu0 %v474_v1  ;;  %v943_v3 = vpop.eup %942 }
 0x1d0   : > { %v469_v5 = vmul.f32 %v943_v3, %v1059_v41  ;;  %v945_v6 = vpop.eup %944  ;;  %v637_v41 = vmul.f32 0.4, %v821_v26 }
 0x1d1   : > { %v463_v10 = vmul.f32 %v945_v6, %v1057_v40 }
 0x1d2   : > { %v476_v7 = vpack.c.bf16 %v469_v5, %v467_v4 }
 0x1d3   : > { %v947_v8 = vpop.eup %946 }
 0x1d4   : > { %v949_v9 = vpop.eup %948  ;;  %881 = vmatprep.mubr.bf16.mxu1 %v476_v7  ;;  %v465_v11 = vmul.f32 %v947_v8, %v1068_v44 }
 0x1d5   : > { %v471_v13 = vmul.f32 %v949_v9, %v1066_v43  ;;  %v638_v43 = vmul.f32 0.4, %v822_v27 }
 0x1d6   : > { %v475_v12 = vpack.c.bf16 %v465_v11, %v463_v10 }
 0x1d7   : > { %v951_v0 = vpop.eup %950 }
 0x1d8   : > { %v473_v14 = vmul.f32 %v951_v0, %v1072_v45  ;;  %878 = vmatmul.mubr.bf16.vlgmr.msra.gmra.mxu0 %v475_v12 }
 0x1da   : > { %v477_v15 = vpack.c.bf16 %v473_v14, %v471_v13 }
 0x1dc   : > { %882 = vmatmul.mubr.bf16.vlgmr.msra.gmra.mxu1 %v477_v15 }
 0x298   : > { %v879_v21 = vpop.f32.mrf.mxu0 }
 0x299   : > { %v609_v28 = vmul.f32 0.6, %v879_v21 }
 0x29a   : > { %v576_v25 = vpop.f32.mrf.mxu0 }
 0x29b   : > { %v607_v36 = vmul.f32 0.6, %v576_v25  ;;  %v641_v44 = vadd.f32 %v633_v29, %v609_v28 }
 0x29c   : > { %v883_v31 = vpop.f32.mrf.mxu1  ;;  %v880_v34 = vpop.f32.mrf.mxu0 }
 0x29d   : > { %v610_v37 = vmul.f32 0.6, %v880_v34  ;;  %v613_v40 = vmul.f32 0.6, %v883_v31  ;;  %v639_v52 = vadd.f32 %v631_v33, %v607_v36 }
 0x29e   : > { %v592_v39 = vpop.f32.mrf.mxu1  ;;  %v579_v42 = vpop.f32.mrf.mxu0 }
 0x29f   : > { %v642_v45 = vadd.f32 %v634_v30, %v610_v37  ;;  %v608_v46 = vmul.f32 0.6, %v579_v42  ;;  %v611_v49 = vmul.f32 0.6, %v592_v39  ;;  %v645_v56 = vadd.f32 %v637_v41, %v613_v40 }
 0x2a0   : > { %v884_v48 = vpop.f32.mrf.mxu1 }
 0x2a1   : > { %v614_v50 = vmul.f32 0.6, %v884_v48  ;;  %v831_v53 = vpack.c.bf16 %v642_v45, %v641_v44  ;;  %v640_v54 = vadd.f32 %v632_v38, %v608_v46  ;;  %v643_v60 = vadd.f32 %v635_v47, %v611_v49 }
 0x2a2   : > { %v595_v55 = vpop.f32.mrf.mxu1 }
 0x2a3   : > { %v646_v57 = vadd.f32 %v638_v43, %v614_v50  ;;  %v612_v58 = vmul.f32 0.6, %v595_v55  ;;  %846 = vst [vmem:[%s270_s30 + $0x8] sm:$0xff] %v831_v53   ;;  %v826_v59 = vpack.c.bf16 %v640_v54, %v639_v52 }
 0x2a5   : > { %v841_v61 = vpack.c.bf16 %v646_v57, %v645_v56  ;;  %v644_v62 = vadd.f32 %v636_v51, %v612_v58  ;;  %827 = vst [vmem:[%s270_s30] sm:$0xff] %v826_v59  }
 0x2a7   : > { %848 = vst [vmem:[%s270_s30 + $0x18] sm:$0xff] %v841_v61   ;;  %v836_v63 = vpack.c.bf16 %v644_v62, %v643_v60 }
 0x2a9   : > { %847 = vst [vmem:[%s270_s30 + $0x10] sm:$0xff] %v836_v63  }
 0x2aa PF: > { %s15_s18 = sadd.s32 1, %s958_s18  }
 0x2ab   : > { %p12_p4 = scmp.ge.s32.totalorder %s15_s18, 4  }
 0x2ad   :  { %14 = sbr.rel (!%p12_p4) target bundleno = 1 (0x1), region = 76 }

// kernel: _magpool_jit.5
= control target key start
LH: loop header
LB: loop body
LE: loop exit
PB: predicated region body
PF: predicated region fallthrough
CT: control target
= control target key end

     0   :  { %s1134_s29 = smov 0   ;;  %s1314_s0 = inlined_call_operand.vmem [shape: f32[128,1], index: 0, kind: input, shape index: {}]   ;;  %s1315_s1 = inlined_call_operand.vmem [shape: f32[1,128], index: 1, kind: input, shape index: {}]   ;;  %s1316_s2 = inlined_call_operand.vmem [shape: s8[128,128], index: 2, kind: input, shape index: {}]   ;;  %s1317_s3 = inlined_call_operand.vmem [shape: bf16[128,128], index: 3, kind: input, shape index: {}]   ;;  %s1318_s4 = inlined_call_operand.vmem [shape: f32[128,128], index: 4, kind: input, shape index: {}]   ;;  %s1319_s5 = inlined_call_operand.vmem [shape: f32[1,128], index: 5, kind: input, shape index: {}]   ;;  %s1320_s6 = inlined_call_operand.<no memory space> [shape: f32[1], index: 6, kind: input, shape index: {}]   ;;  %s1321_s7 = inlined_call_operand.vmem [shape: f32[128,128], index: 7, kind: output, shape index: {0}]   ;;  %s1322_s8 = inlined_call_operand.vmem [shape: f32[128,1], index: 8, kind: output, shape index: {1}]  }
   0x1   :  { %14 = sst [smem:[#allocation2]] %s1320_s6 }
   0x2 LB: > { %s931_s30 = sadd.s32 4294967295, %s1083_s29   ;;  %p935_p0 = scmp.ge.s32.totalorder %s1083_s29, 1  ;;  %s1083_s29 = sphi %s1134_s29, %s20_s29  }
   0x3   : > { %p289_p1 = scmp.lt.s32.totalorder %s1083_s29, 3 }
   0x5   : > { %p290_p2 = pnand %p935_p0, %p289_p1 }
   0x6   : > { %s936_s9 = sshll.u32 (!%p290_p2), %s931_s30, 3  ;;  %s766_s19 = sld [smem:[#allocation2]] (!%p290_p2) }
   0x7   : > { %293 = sbr.rel (%p290_p2) target bundleno = 845 (0x34d), region = 48  ;;  %p339_p3 = scmp.lt.s32.totalorder (!%p290_p2), %s936_s9, 15 }
   0xc   : > { %v1085_v0 = vmov 0   ;;  %s1324_s9 = smov (!%p339_p3, %s936_s9), 15  ;;  %v946_v25 = vld [vmem:[%s1315_s1] ss:$0 sm:$0xff] }
   0xd   : > { %1020 = vset.pattern.permute.xlu1 %v1085_v0  ;;  %1019 = vset.pattern.permute.xlu0 %v1085_v0  ;;  %s1142_s6 = sshll.u32 %s1324_s9, 3  ;;  %s939_s10 = sshll.u32 %s1324_s9, 1 }
   0xe   : > { %s1148_s13 = scalar_lea.vmem %s1314_s0, %s1142_s6  ;;  %s1155_s16 = scalar_lea.vmem %s1316_s2, %s939_s10 }
   0xf   : > { %v375_v1 = vld [vmem:[%s1148_s13 + $0x20] sm:$0xff]  ;;  %v376_v3 = vld [vmem:[%s1148_s13 + $0x28] sm:$0xff]  ;;  %v374_v9 = vld [vmem:[%s1148_s13 + $0x18] sm:$0xff]  ;;  %s1281_s22 = scalar_lea.vmem %s1322_s8, %s1142_s6  ;;  %s360_s25 = scalar_lea.vmem %s1321_s7, %s1142_s6 }
  0x10   : > { %v371_v2 = vld [vmem:[%s1148_s13] sm:$0xff]  ;;  %402 = vperm.xlu1 %1020, %v375_v1   ;;  %v372_v4 = vld [vmem:[%s1148_s13 + $0x8] sm:$0xff]  ;;  %v373_v14 = vld [vmem:[%s1148_s13 + $0x10] sm:$0xff] }
  0x11   : > { %382 = vperm.xlu0 %1019, %v371_v2   ;;  %v450_v5 = vld [vmem:[%s1155_s16] sm:$0x3]  ;;  %v454_v6 = vld [vmem:[%s1155_s16 + $0x8] sm:$0x3]  ;;  %v451_v7 = vld [vmem:[%s1155_s16 + $0x2] sm:$0x3] }
  0x12   : > { %vm458_vm0 = vnez %v450_v5  ;;  %v455_v8 = vld [vmem:[%s1155_s16 + $0xa] sm:$0x3]  ;;  %vm462_vm1 = vnez %v454_v6  ;;  %vm459_vm2 = vnez %v451_v7  ;;  %v452_v15 = vld [vmem:[%s1155_s16 + $0x4] sm:$0x3]  ;;  %v453_v16 = vld [vmem:[%s1155_s16 + $0x6] sm:$0x3] }
  0x13   : > { %v466_v10 = vsel %vm458_vm0, 16843009, %v1085_v0  ;;  %vm463_vm3 = vnez %v455_v8  ;;  %v470_v11 = vsel %vm462_vm1, 16843009, %v1085_v0  ;;  %v467_v12 = vsel %vm459_vm2, 16843009, %v1085_v0 }
  0x14   : > { %407 = vperm.xlu1 %1020, %v376_v3   ;;  %v471_v13 = vsel %vm463_vm3, 16843009, %v1085_v0  ;;  %vm460_vm4 = vnez %v452_v15  ;;  %vm461_vm5 = vnez %v453_v16  ;;  %v378_v18 = vld [vmem:[%s1148_s13 + $0x38] sm:$0xff]  ;;  %v377_v20 = vld [vmem:[%s1148_s13 + $0x30] sm:$0xff]  ;;  %v456_v21 = vld [vmem:[%s1155_s16 + $0xc] sm:$0x3]  ;;  %v474_v28 = vunpack.c.0.s8 %v466_v10 }
  0x15   : > { %387 = vperm.xlu0 %1019, %v372_v4   ;;  %v468_v17 = vsel %vm460_vm4, 16843009, %v1085_v0  ;;  %v1168_v19 = vsel %vm461_vm5, 16843009, %v1085_v0  ;;  %v457_v22 = vld [vmem:[%s1155_s16 + $0xe] sm:$0x3]  ;;  %vm464_vm6 = vnez %v456_v21  ;;  %v478_v31 = vunpack.c.0.s8 %v470_v11  ;;  %s1240_s16 = scalar_lea.vmem %s1318_s4, %s1142_s6 }
  0x16   : > { %vm465_vm7 = vnez %v457_v22  ;;  %v472_v23 = vsel %vm464_vm6, 16843009, %v1085_v0  ;;  %vm482_vm8 = vcmp.ne.s32.totalorder %v474_v28, 0  ;;  %v475_v36 = vunpack.c.0.s8 %v467_v12  ;;  %v1021_v10 = vld [vmem:[%s1317_s3 + $0x38] sm:$0xff]  }
  0x17   : > { %v1173_v24 = vsel %vm465_vm7, 16843009, %v1085_v0  ;;  %vm486_vm9 = vcmp.ne.s32.totalorder %v478_v31, 0  ;;  %v479_v41 = vunpack.c.0.s8 %v471_v13  ;;  %v476_v47 = vunpack.c.0.s8 %v468_v17  ;;  %970 = vmatprep.subr.bf16.mxu0 %v1021_v10  ;;  %994 = vmatprep.subr.bf16.mxu1 %v1021_v10 }
  0x18   : > { %397 = vperm.xlu1 %1020, %v374_v9   ;;  %vm483_vm10 = vcmp.ne.s32.totalorder %v475_v36, 0  ;;  %v477_v58 = vunpack.c.0.s8 %v1168_v19  ;;  %v480_v59 = vunpack.c.0.s8 %v472_v23  ;;  %v481_v4 = vunpack.c.0.s8 %v1173_v24  ;;  %971 = vmatpush3.bf16.msra.mxu0 %v1021_v10 }
  0x19   : > { %392 = vperm.xlu0 %1019, %v373_v14   ;;  %vm487_vm11 = vcmp.ne.s32.totalorder %v479_v41, 0  ;;  %vm484_vm12 = vcmp.ne.s32.totalorder %v476_v47, 0  ;;  %1002 = vmatpush3.bf16.msra.mxu1 %v1021_v10  ;;  %v1026_v47 = vld [vmem:[%s1317_s3 + $0x10] sm:$0xff]   ;;  %vm776_vm0 = vcmask 7168  }
  0x1a   : > { %vm485_vm13 = vcmp.ne.s32.totalorder %v477_v58, 0  ;;  %vm488_vm14 = vcmp.ne.s32.totalorder %v480_v59, 0  ;;  %vm489_vm15 = vcmp.ne.s32.totalorder %v481_v4, 0 }
  0x1c   : > { %417 = vperm.xlu1 %1020, %v378_v18  }
  0x1d   : > { %412 = vperm.xlu0 %1019, %v377_v20  }
  0x8b   : > { %v403_v26 = vpop.permute.xlu1 %402 }
  0x8c   : > { %v383_v27 = vpop.permute.xlu0 %382  ;;  %v430_v29 = vadd.f32 %v946_v25, %v403_v26 }
  0x8d   : > { %v426_v30 = vadd.f32 %v946_v25, %v383_v27 }
  0x8e   : > { %v438_v32 = vmul.f32 0.2, %v430_v29 }
  0x8f   : > { %v434_v33 = vmul.f32 0.2, %v426_v30  ;;  %v408_v34 = vpop.permute.xlu1 %407 }
  0x90   : > { %v388_v35 = vpop.permute.xlu0 %387  ;;  %v431_v37 = vadd.f32 %v946_v25, %v408_v34  ;;  %v446_v40 = vmax.f32 %v430_v29, %v438_v32 }
  0x91   : > { %v427_v38 = vadd.f32 %v946_v25, %v388_v35  ;;  %v442_v39 = vmax.f32 %v426_v30, %v434_v33 }
  0x92   : > { %v439_v42 = vmul.f32 0.2, %v431_v37  ;;  %v494_v51 = vsel %vm486_vm9, %v446_v40, -1e+30  ;;  %v1022_v40 = vld [vmem:[%s1317_s3 + $0x30] sm:$0xff]  }
  0x93   : > { %v435_v43 = vmul.f32 0.2, %v427_v38  ;;  %v490_v44 = vsel %vm482_vm8, %v442_v39, -1e+30  ;;  %v398_v45 = vpop.permute.xlu1 %397  ;;  %972 = vmatprep.subr.bf16.mxu0 %v1022_v40  ;;  %995 = vmatprep.subr.bf16.mxu1 %v1022_v40 }
  0x94   : > { %498 = vmax.xlane.f32.xlu0 %v490_v44  ;;  %v393_v46 = vpop.permute.xlu0 %392  ;;  %v429_v48 = vadd.f32 %v946_v25, %v398_v45  ;;  %v447_v52 = vmax.f32 %v431_v37, %v439_v42  ;;  %973 = vmatpush3.bf16.msra.mxu0 %v1022_v40  ;;  %v1024_v45 = vld [vmem:[%s1317_s3 + $0x20] sm:$0xff]  }
  0x95   : > { %v428_v49 = vadd.f32 %v946_v25, %v393_v46  ;;  %v443_v50 = vmax.f32 %v427_v38, %v435_v43  ;;  %1003 = vmatpush3.bf16.msra.mxu1 %v1022_v40  ;;  %v1025_v46 = vld [vmem:[%s1317_s3 + $0x18] sm:$0xff]  }
  0x96   : > { %v437_v53 = vmul.f32 0.2, %v429_v48  ;;  %v495_v63 = vsel %vm487_vm11, %v447_v52, -1e+30 }
  0x97   : > { %v436_v54 = vmul.f32 0.2, %v428_v49  ;;  %v491_v55 = vsel %vm483_vm10, %v443_v50, -1e+30  ;;  %v418_v56 = vpop.permute.xlu1 %417 }
  0x98   : > { %506 = vmax.xlane.f32.xlu0 %v494_v51  ;;  %500 = vmax.xlane.f32.xlu1 %v491_v55  ;;  %v413_v57 = vpop.permute.xlu0 %412  ;;  %v433_v60 = vadd.f32 %v946_v25, %v418_v56  ;;  %v445_v3 = vmax.f32 %v429_v48, %v437_v53  ;;  %v1027_v48 = vld [vmem:[%s1317_s3 + $0x8] sm:$0xff]  }
  0x99   : > { %v432_v61 = vadd.f32 %v946_v25, %v413_v57  ;;  %v444_v62 = vmax.f32 %v428_v49, %v436_v54  ;;  %v1028_v49 = vld [vmem:[%s1317_s3] sm:$0xff]  }
  0x9a   : > { %v441_v0 = vmul.f32 0.2, %v433_v60  ;;  %v493_v6 = vsel %vm485_vm13, %v445_v3, -1e+30 }
  0x9b   : > { %v440_v1 = vmul.f32 0.2, %v432_v61  ;;  %v492_v2 = vsel %vm484_vm12, %v444_v62, -1e+30 }
  0x9c   : > { %508 = vmax.xlane.f32.xlu0 %v495_v63  ;;  %502 = vmax.xlane.f32.xlu1 %v492_v2  ;;  %v449_v8 = vmax.f32 %v433_v60, %v441_v0 }
  0x9d   : > { %v448_v5 = vmax.f32 %v432_v61, %v440_v1 }
  0x9e   : > { %v497_v9 = vsel %vm489_vm15, %v449_v8, -1e+30 }
  0x9f   : > { %v496_v7 = vsel %vm488_vm14, %v448_v5, -1e+30 }
  0xa0   : > { %504 = vmax.xlane.f32.xlu0 %v493_v6  ;;  %510 = vmax.xlane.f32.xlu1 %v496_v7 }
  0xa4   : > { %512 = vmax.xlane.f32.xlu0 %v497_v9 }
 0x11d   : > { %v499_v11 = vpop.xlane.xlu0 %498 }
 0x11e   : > { %v514_v12 = vsub.f32 %v490_v44, %v499_v11  ;;  %v1023_v44 = vld [vmem:[%s1317_s3 + $0x28] sm:$0xff]  }
 0x11f   : > { %974 = vmatprep.subr.bf16.mxu0 %v1023_v44  ;;  %996 = vmatprep.subr.bf16.mxu1 %v1023_v44 }
 0x120   : > { %v522_v13 = vmul.f32 1.442695, %v514_v12  ;;  %975 = vmatpush3.bf16.msra.mxu0 %v1023_v44  ;;  %1004 = vmatpush3.bf16.msra.mxu1 %v1023_v44 }
 0x121   : > { %v501_v14 = vpop.xlane.xlu1 %500  ;;  %v507_v15 = vpop.xlane.xlu0 %506  ;;  %976 = vmatprep.subr.bf16.mxu0 %v1024_v45  ;;  %997 = vmatprep.subr.bf16.mxu1 %v1024_v45 }
 0x122   : > { %1029 = vpow2.f32 %v522_v13  ;;  %v515_v16 = vsub.f32 %v491_v55, %v501_v14  ;;  %v518_v17 = vsub.f32 %v494_v51, %v507_v15  ;;  %v1243_v14 = vld [vmem:[%s1240_s16 + $0x10] sm:$0xff]  ;;  %v1246_v15 = vld [vmem:[%s1240_s16] sm:$0xff] }
 0x124   : > { %v524_v18 = vmul.f32 1.442695, %v515_v16  ;;  %v530_v19 = vmul.f32 1.442695, %v518_v17  ;;  %977 = vmatpush3.bf16.msra.mxu0 %v1024_v45  ;;  %1005 = vmatpush3.bf16.msra.mxu1 %v1024_v45  ;;  %v721_v16 = vmul.f32 0.4, %v1243_v14 }
 0x125   : > { %v503_v20 = vpop.xlane.xlu1 %502  ;;  %v509_v21 = vpop.xlane.xlu0 %508  ;;  %978 = vmatprep.subr.bf16.mxu0 %v1025_v46  ;;  %998 = vmatprep.subr.bf16.mxu1 %v1025_v46 }
 0x126   : > { %1031 = vpow2.f32 %v524_v18  ;;  %v516_v22 = vsub.f32 %v492_v2, %v503_v20  ;;  %v519_v23 = vsub.f32 %v495_v63, %v509_v21  ;;  %v1250_v18 = vld [vmem:[%s1240_s16 + $0x18] sm:$0xff]  ;;  %v719_v20 = vmul.f32 0.4, %v1246_v15  ;;  %v1254_v21 = vld [vmem:[%s1240_s16 + $0x8] sm:$0xff] }
 0x127   : > { %1033 = vpow2.f32 %v530_v19 }
 0x128   : > { %v526_v24 = vmul.f32 1.442695, %v516_v22  ;;  %v532_v25 = vmul.f32 1.442695, %v519_v23  ;;  %979 = vmatpush3.bf16.msra.mxu0 %v1025_v46  ;;  %1006 = vmatpush3.bf16.msra.mxu1 %v1025_v46  ;;  %v1257_v23 = vld [vmem:[%s1240_s16 + $0x20] sm:$0xff] }
 0x129   : > { %v511_v26 = vpop.xlane.xlu1 %510  ;;  %v505_v27 = vpop.xlane.xlu0 %504  ;;  %980 = vmatprep.subr.bf16.mxu0 %v1026_v47  ;;  %999 = vmatprep.subr.bf16.mxu1 %v1026_v47 }
 0x12a   : > { %1035 = vpow2.f32 %v526_v24  ;;  %v520_v28 = vsub.f32 %v496_v7, %v511_v26  ;;  %v517_v29 = vsub.f32 %v493_v6, %v505_v27  ;;  %v955_v24 = vld [vmem:[%s1319_s5] ss:$0 sm:$0xff]  ;;  %v722_v27 = vmul.f32 0.4, %v1250_v18 }
 0x12b   : > { %1037 = vpow2.f32 %v532_v25 }
 0x12c   : > { %v534_v30 = vmul.f32 1.442695, %v520_v28  ;;  %v528_v31 = vmul.f32 1.442695, %v517_v29  ;;  %981 = vmatpush3.bf16.msra.mxu0 %v1026_v47  ;;  %1007 = vmatpush3.bf16.msra.mxu1 %v1026_v47 }
 0x12d   : > { %v513_v32 = vpop.xlane.xlu0 %512  ;;  %982 = vmatprep.subr.bf16.mxu0 %v1027_v48  ;;  %1000 = vmatprep.subr.bf16.mxu1 %v1027_v48 }
 0x12e   : > { %1039 = vpow2.f32 %v534_v30  ;;  %v521_v33 = vsub.f32 %v497_v9, %v513_v32  ;;  %v720_v30 = vmul.f32 0.4, %v1254_v21 }
 0x12f   : > { %v1183_v34 = vpop.eup %1029  ;;  %1041 = vpow2.f32 %v528_v31 }
 0x130   : > { %v536_v35 = vmul.f32 1.442695, %v521_v33  ;;  %538 = vadd.xlane.f32.xlu1 %v1183_v34  ;;  %983 = vmatpush3.bf16.msra.mxu0 %v1027_v48  ;;  %v1265_v33 = vld [vmem:[%s1240_s16 + $0x30] sm:$0xff] }
 0x131   : > { %1008 = vmatpush3.bf16.msra.mxu1 %v1027_v48  ;;  %984 = vmatprep.subr.bf16.mxu0 %v1028_v49  ;;  %v725_v44 = vmul.f32 0.4, %v1265_v33  ;;  %v1274_v48 = vld [vmem:[%s1240_s16 + $0x38] sm:$0xff] }
 0x132   : > { %1043 = vpow2.f32 %v536_v35  ;;  %1001 = vmatprep.subr.bf16.mxu1 %v1028_v49  ;;  %v723_v35 = vmul.f32 0.4, %v1257_v23 }
 0x133   : > { %v1186_v36 = vpop.eup %1031 }
 0x134   : > { %v1188_v37 = vpop.eup %1033  ;;  %540 = vadd.xlane.f32.xlu0 %v1186_v36  ;;  %985 = vmatpush3.bf16.msra.mxu0 %v1028_v49 }
 0x135   : > { %546 = vadd.xlane.f32.xlu1 %v1188_v37  ;;  %1009 = vmatpush3.bf16.msra.mxu1 %v1028_v49 }
 0x137   : > { %v1192_v38 = vpop.eup %1035 }
 0x138   : > { %v1194_v39 = vpop.eup %1037 }
 0x139   : > { %542 = vadd.xlane.f32.xlu1 %v1192_v38  ;;  %548 = vadd.xlane.f32.xlu0 %v1194_v39 }
 0x13b   : > { %v1201_v41 = vpop.eup %1039 }
 0x13c   : > { %v1203_v42 = vpop.eup %1041 }
 0x13d   : > { %550 = vadd.xlane.f32.xlu1 %v1201_v41  ;;  %544 = vadd.xlane.f32.xlu0 %v1203_v42 }
 0x13f   : > { %v1207_v43 = vpop.eup %1043 }
 0x141   : > { %552 = vadd.xlane.f32.xlu0 %v1207_v43 }
 0x1b9   : > { %v539_v50 = vpop.xlane.xlu1 %538 }
 0x1ba   : > { %1045 = vrcp.f32 %v539_v50 }
 0x1bd   : > { %v541_v51 = vpop.xlane.xlu0 %540 }
 0x1be   : > { %v547_v52 = vpop.xlane.xlu1 %546  ;;  %1047 = vrcp.f32 %v541_v51 }
 0x1bf   : > { %1049 = vrcp.f32 %v547_v52 }
 0x1c2   : > { %v543_v53 = vpop.xlane.xlu1 %542  ;;  %v549_v54 = vpop.xlane.xlu0 %548 }
 0x1c3   : > { %1051 = vrcp.f32 %v549_v54  ;;  %v726_v54 = vmul.f32 0.4, %v1274_v48 }
 0x1c4   : > { %1053 = vrcp.f32 %v543_v53 }
 0x1c6   : > { %v551_v55 = vpop.xlane.xlu1 %550  ;;  %v545_v56 = vpop.xlane.xlu0 %544 }
 0x1c7   : > { %1055 = vrcp.f32 %v545_v56  ;;  %v1046_v57 = vpop.eup %1045 }
 0x1c8   : > { %1057 = vrcp.f32 %v551_v55  ;;  %v555_v60 = vmul.f32 %v1046_v57, %v1183_v34 }
 0x1ca   : > { %v553_v58 = vpop.xlane.xlu0 %552 }
 0x1cb   : > { %v1048_v59 = vpop.eup %1047  ;;  %1059 = vrcp.f32 %v553_v58 }
 0x1cc   : > { %v557_v61 = vmul.f32 %v1048_v59, %v1186_v36  ;;  %v1050_v63 = vpop.eup %1049 }
 0x1cd   : > { %v563_v1 = vmul.f32 %v1050_v63, %v1188_v37  ;;  %v1269_v37 = vld [vmem:[%s1240_s16 + $0x28] sm:$0xff]  ;;  %v767_v63 = vstv %s766_s19 }
 0x1ce   : > { %v570_v62 = vpack.c.bf16 %v557_v61, %v555_v60  ;;  %v724_v45 = vmul.f32 0.4, %v1269_v37 }
 0x1d0   : > { %986 = vmatprep.mubr.bf16.mxu0 %v570_v62  ;;  %v1052_v0 = vpop.eup %1051 }
 0x1d1   : > { %v565_v2 = vmul.f32 %v1052_v0, %v1194_v39  ;;  %v1054_v3 = vpop.eup %1053 }
 0x1d2   : > { %v559_v7 = vmul.f32 %v1054_v3, %v1192_v38 }
 0x1d3   : > { %v572_v4 = vpack.c.bf16 %v565_v2, %v563_v1 }
 0x1d4   : > { %v1056_v5 = vpop.eup %1055 }
 0x1d5   : > { %v1058_v6 = vpop.eup %1057  ;;  %990 = vmatprep.mubr.bf16.mxu1 %v572_v4  ;;  %v561_v8 = vmul.f32 %v1056_v5, %v1203_v42 }
 0x1d6   : > { %v567_v11 = vmul.f32 %v1058_v6, %v1201_v41 }
 0x1d7   : > { %v571_v10 = vpack.c.bf16 %v561_v8, %v559_v7 }
 0x1d8   : > { %v1060_v9 = vpop.eup %1059 }
 0x1d9   : > { %v569_v12 = vmul.f32 %v1060_v9, %v1207_v43  ;;  %987 = vmatmul.mubr.bf16.vlgmr.msra.gmra.mxu0 %v571_v10 }
 0x1db   : > { %v573_v13 = vpack.c.bf16 %v569_v12, %v567_v11 }
 0x1dd   : > { %991 = vmatmul.mubr.bf16.vlgmr.msra.gmra.mxu1 %v573_v13 }
 0x299   : > { %v988_v17 = vpop.f32.mrf.mxu0 }
 0x29a   : > { %v705_v19 = vmul.f32 0.6, %v988_v17 }
 0x29b   : > { %v672_v22 = vpop.f32.mrf.mxu0 }
 0x29c   : > { %v729_v25 = vadd.f32 %v721_v16, %v705_v19  ;;  %v703_v26 = vmul.f32 0.6, %v672_v22 }
 0x29d   : > { %v992_v28 = vpop.f32.mrf.mxu1  ;;  %v989_v29 = vpop.f32.mrf.mxu0 }
 0x29e   : > { %v727_v31 = vadd.f32 %v719_v20, %v703_v26  ;;  %v706_v32 = vmul.f32 0.6, %v989_v29  ;;  %v744_v36 = vmul.f32 %v955_v24, %v729_v25  ;;  %v709_v43 = vmul.f32 0.6, %v992_v28 }
 0x29f   : > { %v688_v34 = vpop.f32.mrf.mxu1  ;;  %v675_v38 = vpop.f32.mrf.mxu0 }
 0x2a0   : > { %v707_v39 = vmul.f32 0.6, %v688_v34  ;;  %v730_v40 = vadd.f32 %v722_v27, %v706_v32  ;;  %v704_v41 = vmul.f32 0.6, %v675_v38  ;;  %754 = vadd.xlane.f32.xlu1 %v744_v36  ;;  %v742_v50 = vmul.f32 %v955_v24, %v727_v31 }
 0x2a1   : > { %v993_v42 = vpop.f32.mrf.mxu1  ;;  %v733_v53 = vadd.f32 %v725_v44, %v709_v43 }
 0x2a2   : > { %v728_v46 = vadd.f32 %v720_v30, %v704_v41  ;;  %v731_v47 = vadd.f32 %v723_v35, %v707_v39  ;;  %v745_v51 = vmul.f32 %v955_v24, %v730_v40  ;;  %v710_v55 = vmul.f32 0.6, %v993_v42 }
 0x2a3   : > { %v691_v49 = vpop.f32.mrf.mxu1  ;;  %v748_v60 = vmul.f32 %v955_v24, %v733_v53 }
 0x2a4   : > { %v708_v52 = vmul.f32 0.6, %v691_v49  ;;  %750 = vadd.xlane.f32.xlu1 %v742_v50  ;;  %756 = vadd.xlane.f32.xlu0 %v745_v51  ;;  %v743_v57 = vmul.f32 %v955_v24, %v728_v46  ;;  %v746_v58 = vmul.f32 %v955_v24, %v731_v47  ;;  %v734_v59 = vadd.f32 %v726_v54, %v710_v55 }
 0x2a6   : > { %v732_v56 = vadd.f32 %v724_v45, %v708_v52  ;;  %v749_v62 = vmul.f32 %v955_v24, %v734_v59 }
 0x2a8   : > { %752 = vadd.xlane.f32.xlu0 %v743_v57  ;;  %758 = vadd.xlane.f32.xlu1 %v746_v58  ;;  %v747_v61 = vmul.f32 %v955_v24, %v732_v56 }
 0x2ac   : > { %762 = vadd.xlane.f32.xlu1 %v748_v60  ;;  %760 = vadd.xlane.f32.xlu0 %v747_v61 }
 0x2b0   : > { %764 = vadd.xlane.f32.xlu0 %v749_v62 }
 0x329   : > { %v755_v0 = vpop.xlane.xlu1 %754 }
 0x32a   : > { %v770_v1 = vadd.f32 %v767_v63, %v755_v0 }
 0x32c   : > { %779 = vst.msk [vmem:[%s1281_s22 + $0x10] sm:$0xff] %vm776_vm0, %v770_v1  ;;  %1061 = vtanh.f32 %v770_v1 }
 0x32d   : > { %v751_v2 = vpop.xlane.xlu1 %750  ;;  %v757_v3 = vpop.xlane.xlu0 %756 }
 0x32e   : > { %v768_v4 = vadd.f32 %v767_v63, %v751_v2  ;;  %v771_v5 = vadd.f32 %v767_v63, %v757_v3 }
 0x330   : > { %777 = vst.msk [vmem:[%s1281_s22] sm:$0xff] %vm776_vm0, %v768_v4  ;;  %1063 = vtanh.f32 %v768_v4  ;;  %780 = vst.msk [vmem:[%s1281_s22 + $0x18] sm:$0xff] %vm776_vm0, %v771_v5 }
 0x331   : > { %1065 = vtanh.f32 %v771_v5  ;;  %v759_v6 = vpop.xlane.xlu1 %758  ;;  %v753_v7 = vpop.xlane.xlu0 %752 }
 0x332   : > { %v772_v8 = vadd.f32 %v767_v63, %v759_v6  ;;  %v769_v9 = vadd.f32 %v767_v63, %v753_v7 }
 0x334   : > { %781 = vst.msk [vmem:[%s1281_s22 + $0x20] sm:$0xff] %vm776_vm0, %v772_v8  ;;  %1067 = vtanh.f32 %v772_v8  ;;  %778 = vst.msk [vmem:[%s1281_s22 + $0x8] sm:$0xff] %vm776_vm0, %v769_v9 }
 0x335   : > { %1069 = vtanh.f32 %v769_v9  ;;  %v763_v10 = vpop.xlane.xlu1 %762  ;;  %v761_v11 = vpop.xlane.xlu0 %760 }
 0x336   : > { %v774_v12 = vadd.f32 %v767_v63, %v763_v10  ;;  %v773_v13 = vadd.f32 %v767_v63, %v761_v11 }
 0x338   : > { %783 = vst.msk [vmem:[%s1281_s22 + $0x30] sm:$0xff] %vm776_vm0, %v774_v12  ;;  %1071 = vtanh.f32 %v774_v12  ;;  %782 = vst.msk [vmem:[%s1281_s22 + $0x28] sm:$0xff] %vm776_vm0, %v773_v13 }
 0x339   : > { %v1062_v16 = vpop.eup %1061  ;;  %1073 = vtanh.f32 %v773_v13  ;;  %v765_v17 = vpop.xlane.xlu0 %764 }
 0x33a   : > { %v803_v19 = vmul.f32 %v1062_v16, %v1243_v14  ;;  %v775_v20 = vadd.f32 %v767_v63, %v765_v17 }
 0x33c   : > { %811 = vst [vmem:[%s360_s25 + $0x10] sm:$0xff] %v803_v19  ;;  %784 = vst.msk [vmem:[%s1281_s22 + $0x38] sm:$0xff] %vm776_vm0, %v775_v20  ;;  %1075 = vtanh.f32 %v775_v20 }
 0x33d   : > { %v1064_v22 = vpop.eup %1063 }
 0x33e   : > { %v1066_v24 = vpop.eup %1065  ;;  %v801_v25 = vmul.f32 %v1064_v22, %v1246_v15 }
 0x33f   : > { %v804_v26 = vmul.f32 %v1066_v24, %v1250_v18 }
 0x340   : > { %809 = vst [vmem:[%s360_s25] sm:$0xff] %v801_v25 }
 0x341   : > { %v1068_v27 = vpop.eup %1067  ;;  %812 = vst [vmem:[%s360_s25 + $0x18] sm:$0xff] %v804_v26 }
 0x342   : > { %v1070_v28 = vpop.eup %1069  ;;  %v805_v29 = vmul.f32 %v1068_v27, %v1257_v23 }
 0x343   : > { %v802_v30 = vmul.f32 %v1070_v28, %v1254_v21 }
 0x344   : > { %813 = vst [vmem:[%s360_s25 + $0x20] sm:$0xff] %v805_v29 }
 0x345   : > { %v1072_v14 = vpop.eup %1071  ;;  %810 = vst [vmem:[%s360_s25 + $0x8] sm:$0xff] %v802_v30 }
 0x346   : > { %v1074_v31 = vpop.eup %1073  ;;  %v807_v32 = vmul.f32 %v1072_v14, %v1265_v33 }
 0x347   : > { %v806_v34 = vmul.f32 %v1074_v31, %v1269_v37 }
 0x348   : > { %815 = vst [vmem:[%s360_s25 + $0x30] sm:$0xff] %v807_v32 }
 0x349   : > { %v1076_v15 = vpop.eup %1075  ;;  %814 = vst [vmem:[%s360_s25 + $0x28] sm:$0xff] %v806_v34 }
 0x34a   : > { %v808_v18 = vmul.f32 %v1076_v15, %v1274_v48 }
 0x34c   : > { %816 = vst [vmem:[%s360_s25 + $0x38] sm:$0xff] %v808_v18 }
 0x34d PF: > { %s20_s29 = sadd.s32 1, %s1083_s29  }
 0x34e   : > { %p17_p4 = scmp.ge.s32.totalorder %s20_s29, 4  }
 0x350   :  { %19 = sbr.rel (!%p17_p4) target bundleno = 2 (0x2), region = 96 }

</bundles_post_ra>
